<compile_context>
chip_gen: v5e
topology: v5e:2x2
jax: 0.10.0
libtpu: 0.0.40
codegen_flags: <defaults>
</compile_context>

<pallas_src>
import functools
import math

import jax
import jax.numpy as jnp
from jax import lax
from jax.experimental import pallas as pl
from jax.experimental.pallas import tpu as pltpu


BN_EPS = 1e-5


def _device_kind():
    try:
        return jax.devices()[0].device_kind.lower()
    except Exception:
        return ""


_KIND = _device_kind()
_IS_V56 = ("v5" in _KIND) or ("v6" in _KIND)

# v7x has 64 MiB VMEM/TC -> conservative budget there; v5e/v6e have 128 MiB.
VMEM_LIMIT = (96 if _IS_V56 else 40) * 1024 * 1024
TM_MAX = 512                          # M tile for the matmul kernel
TS_MAX = 2048 if _IS_V56 else 1024    # spatial row tile for fused CBAM kernels


# ---------------------------------------------------------------------------
# Pallas matmul kernel (bf16 MXU, f32 accumulate, fused bias + activation)
# Used for every 1x1x1 conv (BN folded) and the final linear layers.
# Weights are EXACT (K, N); no activation K-pad, no output slice.
# ---------------------------------------------------------------------------

def _mm_kernel(a_ref, b_ref, bias_ref, o_ref, *, act):
    r = jnp.dot(a_ref[...], b_ref[...], preferred_element_type=jnp.float32)
    r = r + bias_ref[...]
    if act == "relu":
        r = jnp.maximum(r, 0.0)
    elif act == "sigmoid":
        r = jax.nn.sigmoid(r)
    o_ref[...] = r.astype(o_ref.dtype)


_MM_CACHE = {}


def _build_mm(M, K, N, tm, act, out_dtype):
    kern = functools.partial(_mm_kernel, act=act)
    gm = -(-M // tm)

    def fn(a, w, b):
        return pl.pallas_call(
            kern,
            out_shape=jax.ShapeDtypeStruct((M, N), out_dtype),
            grid_spec=pltpu.PrefetchScalarGridSpec(
                num_scalar_prefetch=0,
                grid=(gm,),
                in_specs=[
                    pl.BlockSpec((tm, K), lambda m: (m, 0)),
                    pl.BlockSpec((K, N), lambda m: (0, 0)),
                    pl.BlockSpec((1, N), lambda m: (0, 0)),
                ],
                out_specs=pl.BlockSpec((tm, N), lambda m: (m, 0))),
            compiler_params=pltpu.CompilerParams(
                dimension_semantics=("parallel",),
                vmem_limit_bytes=VMEM_LIMIT),
        )(a, w, b)

    return jax.jit(fn)


def pallas_matmul(a, w, bias, act=None, out_dtype=jnp.bfloat16):
    """act(a @ w + bias).  a: (M,K); w: (K,N) bf16; bias: (1,N) f32."""
    M, K = a.shape
    Kw, N = w.shape
    assert K == Kw, (K, Kw)
    a = a.astype(jnp.bfloat16)
    tm = M if M <= TM_MAX else TM_MAX
    key = (M, K, N, tm, act, jnp.dtype(out_dtype).name)
    if key not in _MM_CACHE:
        _MM_CACHE[key] = _build_mm(M, K, N, tm, act, out_dtype)
    return _MM_CACHE[key](a, w, bias)


# ---------------------------------------------------------------------------
# Pallas tap-decomposed 3x3x3 conv (padding=1, stride=1), BN folded + ReLU.
# Input is padded in D,H and row-flattened; the kd tap is the accumulation
# grid axis, the 9 (kh,kw) taps are unrolled with static row slices plus a
# column mask for the (un-padded) W border.  No im2col / HBM patch matrix.
# ---------------------------------------------------------------------------

def _conv3x3_kernel(x_ref, w_ref, b_ref, o_ref, acc_ref, *, H, W):
    kd = pl.program_id(2)
    HW = H * W

    @pl.when(kd == 0)
    def _():
        acc_ref[...] = jnp.zeros_like(acc_ref)

    col = lax.broadcasted_iota(jnp.int32, (HW, 1), 0) % W
    acc = acc_ref[...]
    for kh in range(3):
        base = kh * W
        for kw in range(3):
            patch = x_ref[0, 0, base + kw:base + kw + HW, :]
            if kw == 0:
                patch = jnp.where(col >= 1, patch, jnp.zeros_like(patch))
            elif kw == 2:
                patch = jnp.where(col < W - 1, patch, jnp.zeros_like(patch))
            acc = acc + jnp.dot(patch, w_ref[0, kh, kw],
                                preferred_element_type=jnp.float32)
    acc_ref[...] = acc

    @pl.when(kd == 2)
    def _():
        r = jnp.maximum(acc_ref[...] + b_ref[...], 0.0)
        o_ref[0, 0, :, :] = r.astype(o_ref.dtype)


_CONV3_CACHE = {}


def _build_conv3(B, D, H, W, C, N):
    HW = H * W
    Rp = (H + 2) * W + 2           # (H+2) rows of width W, plus 2 guard rows
    kern = functools.partial(_conv3x3_kernel, H=H, W=W)

    call = pl.pallas_call(
        kern,
        out_shape=jax.ShapeDtypeStruct((B, D, HW, N), jnp.bfloat16),
        grid_spec=pltpu.PrefetchScalarGridSpec(
            num_scalar_prefetch=0,
            grid=(B, D, 3),
            in_specs=[
                pl.BlockSpec((1, 1, Rp, C), lambda b, d, t: (b, d + t, 0, 0)),
                pl.BlockSpec((1, 3, 3, C, N), lambda b, d, t: (t, 0, 0, 0, 0)),
                pl.BlockSpec((1, N), lambda b, d, t: (0, 0)),
            ],
            out_specs=pl.BlockSpec((1, 1, HW, N), lambda b, d, t: (b, d, 0, 0)),
            scratch_shapes=[pltpu.VMEM((HW, N), jnp.float32)]),
        compiler_params=pltpu.CompilerParams(
            dimension_semantics=("parallel", "parallel", "arbitrary"),
            vmem_limit_bytes=VMEM_LIMIT))

    def fn(x, w, b):
        xp = jnp.pad(x.astype(jnp.bfloat16),
                     ((0, 0), (1, 1), (1, 1), (0, 0), (0, 0)))   # pad D, H
        xf = xp.reshape(B, D + 2, (H + 2) * W, C)
        xf = jnp.pad(xf, ((0, 0), (0, 0), (1, 1), (0, 0)))       # guard rows
        out = call(xf, w, b)
        return out.reshape(B, D, H, W, N)

    return jax.jit(fn)


def conv3x3_cl(x, wp):
    """Channels-last 3x3x3 conv, padding=1, folded BN + fused ReLU."""
    B, D, H, W, C = x.shape
    N = wp["w"].shape[-1]
    key = (B, D, H, W, C, N)
    if key not in _CONV3_CACHE:
        _CONV3_CACHE[key] = _build_conv3(B, D, H, W, C, N)
    return _CONV3_CACHE[key](x, wp["w"], wp["b"])


def conv1x1_cl(x, wp, act="relu"):
    """Channels-last 1x1x1 conv (folded BN) as a Pallas matmul."""
    B, D, H, W, C = x.shape
    N = wp["w"].shape[1]
    out = pallas_matmul(x.reshape(B * D * H * W, C), wp["w"], wp["b"], act=act)
    return out.reshape(B, D, H, W, N)


# ---------------------------------------------------------------------------
# Fused CBAM element-wise Pallas kernels (batched, tiled over spatial rows)
# ---------------------------------------------------------------------------

def _cbam_stats_kernel(x_ref, ca_ref, mx_ref, mn_ref):
    # per-position max / min over channels of the channel-attended tensor x*ca
    y = x_ref[...].astype(jnp.float32) * ca_ref[...]
    mx_ref[...] = jnp.max(y, axis=-1, keepdims=True).astype(mx_ref.dtype)
    mn_ref[...] = jnp.min(y, axis=-1, keepdims=True).astype(mn_ref.dtype)


def _cbam_apply_kernel(x_ref, ca_ref, sa_ref, o_ref):
    # CBAM output: x * x_out with x_out = (x*ca)*sa  (matches the PyTorch ref)
    x = x_ref[...].astype(jnp.float32)
    o_ref[...] = (x * x * ca_ref[...] * sa_ref[...]).astype(o_ref.dtype)


_CBAM_STATS_CACHE = {}
_CBAM_APPLY_CACHE = {}


def _cbam_tiles(S):
    ts = S if S <= TS_MAX else TS_MAX
    return ts, -(-S // ts)


def pallas_cbam_stats(x, ca):
    """x: (B,S,C) bf16, ca: (B,1,C) f32 -> (max, min) over C of x*ca, f32."""
    B, S, C = x.shape
    ts, gs = _cbam_tiles(S)
    key = (B, S, C, ts, x.dtype.name)
    if key not in _CBAM_STATS_CACHE:
        def fn(xx, cc):
            return pl.pallas_call(
                _cbam_stats_kernel,
                out_shape=(jax.ShapeDtypeStruct((B, S, 1), jnp.float32),
                           jax.ShapeDtypeStruct((B, S, 1), jnp.float32)),
                grid_spec=pltpu.PrefetchScalarGridSpec(
                    num_scalar_prefetch=0,
                    grid=(B, gs),
                    in_specs=[
                        pl.BlockSpec((1, ts, C), lambda b, s: (b, s, 0)),
                        pl.BlockSpec((1, 1, C), lambda b, s: (b, 0, 0)),
                    ],
                    out_specs=(
                        pl.BlockSpec((1, ts, 1), lambda b, s: (b, s, 0)),
                        pl.BlockSpec((1, ts, 1), lambda b, s: (b, s, 0)))),
                compiler_params=pltpu.CompilerParams(
                    dimension_semantics=("parallel", "parallel"),
                    vmem_limit_bytes=VMEM_LIMIT),
            )(xx, cc)
        _CBAM_STATS_CACHE[key] = jax.jit(fn)
    return _CBAM_STATS_CACHE[key](x, ca)


def pallas_cbam_apply(x, ca, sa):
    """Fused CBAM output x*(x*ca*sa); x: (B,S,C), ca: (B,1,C), sa: (B,S,1)."""
    B, S, C = x.shape
    ts, gs = _cbam_tiles(S)
    key = (B, S, C, ts, x.dtype.name)
    if key not in _CBAM_APPLY_CACHE:
        def fn(xx, cc, ss):
            return pl.pallas_call(
                _cbam_apply_kernel,
                out_shape=jax.ShapeDtypeStruct((B, S, C), jnp.bfloat16),
                grid_spec=pltpu.PrefetchScalarGridSpec(
                    num_scalar_prefetch=0,
                    grid=(B, gs),
                    in_specs=[
                        pl.BlockSpec((1, ts, C), lambda b, s: (b, s, 0)),
                        pl.BlockSpec((1, 1, C), lambda b, s: (b, 0, 0)),
                        pl.BlockSpec((1, ts, 1), lambda b, s: (b, s, 0)),
                    ],
                    out_specs=pl.BlockSpec((1, ts, C), lambda b, s: (b, s, 0))),
                compiler_params=pltpu.CompilerParams(
                    dimension_semantics=("parallel", "parallel"),
                    vmem_limit_bytes=VMEM_LIMIT),
            )(xx, cc, ss)
        _CBAM_APPLY_CACHE[key] = jax.jit(fn)
    return _CBAM_APPLY_CACHE[key](x, ca, sa)


# ---------------------------------------------------------------------------
# JAX glue: big-kernel convs (XLA), pooling
# ---------------------------------------------------------------------------

def conv3d_lax(x, w, b, stride, padding, act=None):
    """Channels-last conv via XLA (used for conv1 7x7x7/s2 and CBAM sa conv)."""
    out = lax.conv_general_dilated(
        x, w, window_strides=stride,
        padding=[(p, p) for p in padding],
        dimension_numbers=("NDHWC", "DHWIO", "NDHWC"),
        preferred_element_type=jnp.float32)
    out = out + b
    if act == "relu":
        out = jnp.maximum(out, 0.0)
    elif act == "sigmoid":
        out = jax.nn.sigmoid(out)
    return out


def maxpool3d_cl(x, ksize, stride, padding):
    return lax.reduce_window(
        x, jnp.array(-jnp.inf, x.dtype), lax.max,
        window_dimensions=(1,) + ksize + (1,),
        window_strides=(1,) + stride + (1,),
        padding=((0, 0),) + tuple((p, p) for p in padding) + ((0, 0),))


# ---------------------------------------------------------------------------
# CBAM / Inception / full model (channels-last, batched)
# ---------------------------------------------------------------------------

def cbam_forward(x, p):
    B, D, H, W, C = x.shape
    S = D * H * W
    x3 = x.reshape(B, S, C)
    # Channel attention: global avg pool + tiny MLP (jnp; MXU would idle).
    avg = jnp.mean(x3.astype(jnp.float32), axis=1)                   # (B, C)
    h = jnp.maximum(avg @ p["fc1_w"].T, 0.0)                         # (B, C/r)
    ca = jax.nn.sigmoid(h @ p["fc2_w"].T)                            # (B, C)
    ca3 = ca.reshape(B, 1, C)
    # Spatial attention descriptor on the channel-attended tensor: [max, min].
    mx, mn = pallas_cbam_stats(x3, ca3)                              # (B,S,1)
    sp = jnp.concatenate([mx, mn], axis=-1).reshape(B, D, H, W, 2)
    sa = conv3d_lax(sp, p["sa_w"], p["sa_b"], (1, 1, 1), (3, 3, 3),
                    act="sigmoid")                                   # (B,D,H,W,1)
    # CBAM output: x * ((x*ca) * sa), fused (no y round-trip).
    out = pallas_cbam_apply(x3, ca3, sa.reshape(B, S, 1))
    return out.reshape(B, D, H, W, C)


def inception_forward(x, p):
    x1 = conv1x1_cl(x, p["b1"])
    x2 = conv1x1_cl(x1, p["b2a"])
    x2 = conv3x3_cl(x2, p["b2b"])
    x3 = conv1x1_cl(x2, p["b3a"])
    x3 = conv3x3_cl(x3, p["b3b"])
    x4 = maxpool3d_cl(x3, (3, 3, 3), (1, 1, 1), (1, 1, 1))
    x4 = conv1x1_cl(x4, p["b4"])
    xc = jnp.concatenate([x1, x2, x3, x4], axis=-1)
    return cbam_forward(xc, p["cbam"])


_INCEPTION_NAMES = ["inc1", "inc2", "inc3a", "inc3b",
                    "inc4a", "inc4b", "inc5a", "inc5b"]


def i3d_with_cbam_forward(x, pp):
    """x: (B, 3, D, H, W) float32 (PyTorch NCDHW layout)."""
    x = jnp.transpose(x, (0, 2, 3, 4, 1)).astype(jnp.bfloat16)      # -> NDHWC
    c1 = pp["conv1"]
    x = conv3d_lax(x, c1["w"], c1["b"], (2, 2, 2), (3, 3, 3), act="relu")
    x = x.astype(jnp.bfloat16)
    x = maxpool3d_cl(x, (1, 2, 2), (1, 2, 2), (0, 0, 0))
    for name in _INCEPTION_NAMES:
        x = inception_forward(x, pp[name])
    # AdaptiveAvgPool3d(1) + Flatten.
    B, D, H, W, C = x.shape
    f = jnp.mean(x.reshape(B, D * H * W, C).astype(jnp.float32), axis=1)
    # Dropout(0.3): eval mode -> identity (see TODO at top).
    f = pallas_matmul(f, pp["linear1"]["w"], pp["linear1"]["b"],
                      out_dtype=jnp.float32)
    f = pallas_matmul(f, pp["linear2"]["w"], pp["linear2"]["b"],
                      out_dtype=jnp.float32)
    f = pallas_matmul(f, pp["linear3"]["w"], pp["linear3"]["b"],
                      out_dtype=jnp.float32)
    out = pallas_matmul(f, pp["linear4"]["w"], pp["linear4"]["b"],
                        act="sigmoid", out_dtype=jnp.float32)
    return out


# ---------------------------------------------------------------------------
# Deterministic parameter initialization (shapes from the PyTorch __init__)
# ---------------------------------------------------------------------------

def _conv_bn_params(key, cin, cout, ksize):
    kw, kb, kbeta, kmean = jax.random.split(key, 4)
    fan_in = cin * ksize[0] * ksize[1] * ksize[2]
    w = jax.random.normal(kw, (cout, cin) + ksize, jnp.float32) * math.sqrt(2.0 / fan_in)
    b = jax.random.normal(kb, (cout,), jnp.float32) * 0.01
    gamma = jnp.ones((cout,), jnp.float32)
    beta = jax.random.normal(kbeta, (cout,), jnp.float32) * 0.01
    mean = jax.random.normal(kmean, (cout,), jnp.float32) * 0.01
    var = jnp.ones((cout,), jnp.float32)
    return {"w": w, "b": b, "bn": (gamma, beta, mean, var)}


def _cbam_params(key, c, reduction=16):
    r = c // reduction
    k1, k2, k3, k4 = jax.random.split(key, 4)
    return {
        "fc1_w": jax.random.normal(k1, (r, c), jnp.float32) * math.sqrt(1.0 / c),
        "fc2_w": jax.random.normal(k2, (c, r), jnp.float32) * math.sqrt(1.0 / r),
        "sa_w": jax.random.normal(k3, (1, 2, 7, 7, 7), jnp.float32) * math.sqrt(1.0 / (2 * 343)),
        "sa_b": jax.random.normal(k4, (1,), jnp.float32) * 0.01,
    }


def _inception_params(key, cin, oc):
    keys = jax.random.split(key, 7)
    nc = oc[0] + oc[2] + oc[4] + oc[5]
    return {
        "b1": _conv_bn_params(keys[0], cin, oc[0], (1, 1, 1)),
        "b2a": _conv_bn_params(keys[1], oc[0], oc[1], (1, 1, 1)),
        "b2b": _conv_bn_params(keys[2], oc[1], oc[2], (3, 3, 3)),
        "b3a": _conv_bn_params(keys[3], oc[2], oc[3], (1, 1, 1)),
        "b3b": _conv_bn_params(keys[4], oc[3], oc[4], (3, 3, 3)),
        "b4": _conv_bn_params(keys[5], oc[4], oc[5], (1, 1, 1)),
        "cbam": _cbam_params(keys[6], nc),
    }


def _linear_params(key, cin, cout):
    kw, kb = jax.random.split(key)
    w = jax.random.normal(kw, (cout, cin), jnp.float32) * math.sqrt(1.0 / cin)
    b = jax.random.normal(kb, (cout,), jnp.float32) * 0.01
    return {"w": w, "b": b}


def init_params(key, num_classes=2):
    keys = jax.random.split(key, 13)
    cfg = [
        (64,  [64, 96, 128, 16, 32, 32]),
        (256, [128, 128, 192, 32, 96, 64]),
        (480, [192, 96, 208, 16, 48, 64]),
        (512, [160, 112, 224, 24, 64, 64]),
        (512, [128, 128, 256, 24, 64, 64]),
        (512, [112, 144, 288, 32, 64, 64]),
        (528, [256, 160, 320, 32, 128, 128]),
        (832, [384, 192, 384, 48, 128, 128]),
    ]
    params = {"conv1": _conv_bn_params(keys[0], 3, 64, (7, 7, 7))}
    for i, (name, (cin, oc)) in enumerate(zip(_INCEPTION_NAMES, cfg)):
        params[name] = _inception_params(keys[1 + i], cin, oc)
    params["linear1"] = _linear_params(keys[9], 1024, 512)
    params["linear2"] = _linear_params(keys[10], 512, 256)
    params["linear3"] = _linear_params(keys[11], 256, 64)
    params["linear4"] = _linear_params(keys[12], 64, num_classes)
    return params


# ---------------------------------------------------------------------------
# One-time parameter preparation: fold BN, transpose, cast (no padding).
# ---------------------------------------------------------------------------

def _fold_bn(p):
    gamma, beta, mean, var = p["bn"]
    s = gamma / jnp.sqrt(var + BN_EPS)
    w = p["w"] * s[:, None, None, None, None]
    b = (p["b"] - mean) * s + beta
    return w, b


def _prep_conv1x1(p):
    w, b = _fold_bn(p)
    cout, cin = w.shape[0], w.shape[1]
    return {"w": w.reshape(cout, cin).T.astype(jnp.bfloat16),
            "b": b.reshape(1, cout).astype(jnp.float32)}


def _prep_conv3x3(p):
    w, b = _fold_bn(p)
    # (Cout, Cin, kd, kh, kw) -> (kd, kh, kw, Cin, Cout)
    return {"w": jnp.transpose(w, (2, 3, 4, 1, 0)).astype(jnp.bfloat16),
            "b": b.reshape(1, -1).astype(jnp.float32)}


def _prep_conv_lax(p):
    w, b = _fold_bn(p)
    return {"w": jnp.transpose(w, (2, 3, 4, 1, 0)).astype(jnp.bfloat16),
            "b": b.astype(jnp.float32)}


def _prep_cbam(p):
    return {
        "fc1_w": p["fc1_w"].astype(jnp.float32),
        "fc2_w": p["fc2_w"].astype(jnp.float32),
        "sa_w": jnp.transpose(p["sa_w"], (2, 3, 4, 1, 0)).astype(jnp.float32),
        "sa_b": p["sa_b"].astype(jnp.float32),
    }


def _prep_linear(p):
    return {"w": p["w"].T.astype(jnp.bfloat16),
            "b": p["b"].reshape(1, -1).astype(jnp.float32)}


def prepare_params(params):
    """Fold BatchNorm and transpose/cast weights once (outside hot path)."""
    pp = {"conv1": _prep_conv_lax(params["conv1"])}
    for name in _INCEPTION_NAMES:
        q = params[name]
        pp[name] = {
            "b1": _prep_conv1x1(q["b1"]),
            "b2a": _prep_conv1x1(q["b2a"]),
            "b2b": _prep_conv3x3(q["b2b"]),
            "b3a": _prep_conv1x1(q["b3a"]),
            "b3b": _prep_conv3x3(q["b3b"]),
            "b4": _prep_conv1x1(q["b4"]),
            "cbam": _prep_cbam(q["cbam"]),
        }
    for name in ("linear1", "linear2", "linear3", "linear4"):
        pp[name] = _prep_linear(params[name])
    return pp


if __name__ == "__main__":
    key = jax.random.PRNGKey(0)
    kx, kp = jax.random.split(key)
    # Small video clip in NCDHW: (batch=2, channels=3, depth=4, H=16, W=16)
    x = jax.random.normal(kx, (2, 3, 4, 16, 16), jnp.float32)
    params = init_params(kp, num_classes=2)
    prepped = prepare_params(params)
    out = i3d_with_cbam_forward(x, prepped)
    out = jax.block_until_ready(out)
    assert out.shape == (2, 2), out.shape
    assert bool(jnp.all(jnp.isfinite(out)))
    print("KERNEL_OK")
</pallas_src>

<mosaic_0001>
module attributes {stable_mosaic.version = 11 : i64} {
  func.func @_mm_kernel(%arg0: i32, %arg1: memref<64x64xbf16, #tpu.memory_space<vmem>>, %arg2: memref<64x64xbf16, #tpu.memory_space<vmem>>, %arg3: memref<1x64xf32, #tpu.memory_space<vmem>>, %arg4: memref<64x64xbf16, #tpu.memory_space<vmem>>) attributes {dimension_semantics = [#tpu.dimension_semantics<parallel>], iteration_bounds = array<i64: 1>, scalar_prefetch = 0 : i64, scratch_operands = 0 : i64, tpu.core_type = #tpu.core_type<tc>, window_params = [{transform_indices = @transform_0, window_bounds = array<i64: 64, 64>}, {pipeline_mode = #tpu.pipeline_mode<synchronous>, transform_indices = @transform_1, window_bounds = array<i64: 64, 64>}, {pipeline_mode = #tpu.pipeline_mode<synchronous>, transform_indices = @transform_2, window_bounds = array<i64: 1, 64>}, {transform_indices = @transform_3, window_bounds = array<i64: 64, 64>}]} {
    %c0 = arith.constant 0 : index
    %c0_0 = arith.constant 0 : index
    %0 = vector.load %arg1[%c0, %c0_0] : memref<64x64xbf16, #tpu.memory_space<vmem>>, vector<64x64xbf16>
    %c0_1 = arith.constant 0 : index
    %c0_2 = arith.constant 0 : index
    %1 = vector.load %arg2[%c0_1, %c0_2] : memref<64x64xbf16, #tpu.memory_space<vmem>>, vector<64x64xbf16>
    %cst = arith.constant dense<0.000000e+00> : vector<64x64xf32>
    %2 = tpu.matmul %0, %1, %cst {dimension_numbers = #tpu.dot_dimension_numbers<[1], [0], [0], [1], [0, 0, 1, 1], [], []>} : vector<64x64xbf16>, vector<64x64xbf16>, vector<64x64xf32> -> vector<64x64xf32>
    %c0_3 = arith.constant 0 : index
    %c0_4 = arith.constant 0 : index
    %3 = vector.load %arg3[%c0_3, %c0_4] : memref<1x64xf32, #tpu.memory_space<vmem>>, vector<1x64xf32>
    %4 = vector.broadcast %3 : vector<1x64xf32> to vector<64x64xf32>
    %5 = arith.addf %2, %4 : vector<64x64xf32>
    %cst_5 = arith.constant 0.000000e+00 : f32
    %6 = vector.broadcast %cst_5 : f32 to vector<64x64xf32>
    %7 = arith.maximumf %5, %6 : vector<64x64xf32>
    %8 = arith.truncf %7 : vector<64x64xf32> to vector<64x64xbf16>
    %c0_6 = arith.constant 0 : index
    %c0_7 = arith.constant 0 : index
    %9 = vector.load %arg4[%c0_6, %c0_7] : memref<64x64xbf16, #tpu.memory_space<vmem>>, vector<64x64xbf16>
    tpu.vector_store %arg4[%c0_6, %c0_7], %8 {strides = array<i32>} : memref<64x64xbf16, #tpu.memory_space<vmem>>, vector<64x64xbf16>,
    return
  }
  func.func @transform_0(%arg0: i32) -> (i32, i32) {
    %c0_i32 = arith.constant 0 : i32
    %c0_i32_0 = arith.constant 0 : i32
    return %arg0, %c0_i32 : i32, i32
  }
  func.func @transform_1(%arg0: i32) -> (i32, i32) {
    %c0_i32 = arith.constant 0 : i32
    %c0_i32_0 = arith.constant 0 : i32
    %c0_i32_1 = arith.constant 0 : i32
    return %c0_i32, %c0_i32_0 : i32, i32
  }
  func.func @transform_2(%arg0: i32) -> (i32, i32) {
    %c0_i32 = arith.constant 0 : i32
    %c0_i32_0 = arith.constant 0 : i32
    %c0_i32_1 = arith.constant 0 : i32
    return %c0_i32, %c0_i32_0 : i32, i32
  }
  func.func @transform_3(%arg0: i32) -> (i32, i32) {
    %c0_i32 = arith.constant 0 : i32
    %c0_i32_0 = arith.constant 0 : i32
    return %arg0, %c0_i32 : i32, i32
  }
}

</mosaic_0001>

<bundles_post_ra>
// kernel: fn.1
= control target key start
LH: loop header
LB: loop body
LE: loop exit
PB: predicated region body
PF: predicated region fallthrough
CT: control target
= control target key end

     0   :  { %8 = vsyncpa [#allocation3], 0  ;;  %s393_s0 = inlined_call_operand.hbm [shape: bf16[64,64], index: 0, kind: input, shape index: {}]   ;;  %s394_s1 = inlined_call_operand.hbm [shape: bf16[64,64], index: 1, kind: input, shape index: {}]   ;;  %s395_s2 = inlined_call_operand.vmem [shape: f32[1,64], index: 2, kind: input, shape index: {}]   ;;  %s396_s3 = inlined_call_operand.hbm [shape: bf16[64,64], index: 3, kind: output, shape index: {}]  }
   0x1   :  { %9 = vsyncpa [#allocation6], 0 }
   0x2   :  { %10 = vsyncpa [#allocation4], 0  ;;  %s15_s14 = sshll.u32 %s393_s0, 4  ;;  %s339_s15 = smov [#allocation2]   ;;  %s16_s14 = int_to_ptr.hbm [resolvable:$true] %s15_s14 }
   0x3   :  { %s17_s16 = sshll.u32 %s339_s15, 4  ;;  %s28_s19 = sshll.u32 %s394_s1, 4  ;;  %s18_s16 = int_to_ptr.vmem [resolvable:$true] %s17_s16  ;;  %s29_s19 = int_to_ptr.hbm [resolvable:$true] %s28_s19 }
   0x4   :  { %s340_s20 = smov 64   ;;  %s341_s21 = smov 4  }
   0x5   :  { %23 = dma.hbm_to_vmem [thread:$0]  %s16_s14, 512, %s18_s16, [#allocation3], %s340_s20, %s340_s20, %s341_s21  }
   0x6   :  { %s342_s22 = smov [#allocation5]  }
   0x7   :  { %s30_s23 = sshll.u32 %s342_s22, 4  ;;  %s31_s23 = int_to_ptr.vmem [resolvable:$true] %s30_s23 }
   0x8   :  { %36 = dma.hbm_to_vmem [thread:$0]  %s29_s19, 512, %s31_s23, [#allocation6], %s340_s20, %s340_s20, %s341_s21  }
   0x9   :  { %333 = dma.done.wait [#allocation3], 512  }
   0xa   :  { %334 = vsyncadd [#allocation3], 4294966784 }
   0xb   :  { %335 = dma.done.wait [#allocation6], 512  }
   0xc   :  { %336 = vsyncadd [#allocation6], 4294966784  ;;  %v242_v0 = vld [vmem:[#allocation5 + $0x18] sm:$0xff]  ;;  %v241_v1 = vld [vmem:[#allocation5 + $0x10] sm:$0xff]  ;;  %vm112_vm0 = vcmask 523264   ;;  %vm170_vm1 = vcmask 519168  }
   0xd   :  { %129 = vmatpush.bf16.msra.mxu0 %v242_v0  ;;  %243 = vmatpush.bf16.msra.mxu1 %v242_v0  ;;  %v240_v2 = vld [vmem:[#allocation5 + $0x8] sm:$0xff]  ;;  %v239_v3 = vld [vmem:[#allocation5] sm:$0xff]  ;;  %v237_v6 = vld [vmem:[#allocation2 + $0x10] sm:$0xff]  ;;  %s185_s27 = sshll.u32 %s396_s3, 4  ;;  %s186_s27 = int_to_ptr.hbm [resolvable:$true] %s185_s27 }
   0xe   :  { %244 = vmatpush.bf16.msra.mxu2 %v242_v0  ;;  %245 = vmatpush.bf16.msra.mxu3 %v242_v0  ;;  %v235_v4 = vld [vmem:[#allocation2] sm:$0xff]  ;;  %v236_v5 = vld [vmem:[#allocation2 + $0x8] sm:$0xff]  ;;  %v238_v7 = vld [vmem:[#allocation2 + $0x18] sm:$0xff] }
   0xf   :  { %v260_v8 = vld [vmem:[%s395_s2] ss:$0 sm:$0xff]  ;;  %s343_s2 = smov [#allocation7]  }
  0x10   :  { %s183_s24 = sshll.u32 %s343_s2, 4  ;;  %s184_s24 = int_to_ptr.vmem [resolvable:$true] %s183_s24 }
  0x11   :  { %130 = vmatpush.bf16.msra.mxu0 %v241_v1  ;;  %246 = vmatpush.bf16.msra.mxu1 %v241_v1 }
  0x12   :  { %247 = vmatpush.bf16.msra.mxu2 %v241_v1  ;;  %248 = vmatpush.bf16.msra.mxu3 %v241_v1 }
  0x15   :  { %131 = vmatpush.bf16.msra.mxu0 %v240_v2  ;;  %249 = vmatpush.bf16.msra.mxu1 %v240_v2 }
  0x16   :  { %250 = vmatpush.bf16.msra.mxu2 %v240_v2  ;;  %251 = vmatpush.bf16.msra.mxu3 %v240_v2 }
  0x19   :  { %132 = vmatpush.bf16.msra.mxu0 %v239_v3  ;;  %252 = vmatpush.bf16.msra.mxu1 %v239_v3 }
  0x1a   :  { %253 = vmatpush.bf16.msra.mxu2 %v239_v3  ;;  %254 = vmatpush.bf16.msra.mxu3 %v239_v3 }
  0x1c   :  { %231 = vmatmul.msk.bf16.vlgmr.msra.gmra.mxu0 %vm112_vm0, %v235_v4  ;;  %232 = vmatmul.msk.bf16.vlgmr.msra.gmra.mxu1 %vm112_vm0, %v236_v5 }
  0x1d   :  { %233 = vmatmul.msk.bf16.vlgmr.msra.gmra.mxu2 %vm112_vm0, %v237_v6  ;;  %234 = vmatmul.msk.bf16.vlgmr.msra.gmra.mxu3 %vm112_vm0, %v238_v7 }
  0x99   :  { %v134_v9 = vpop.f32.mrf.mxu0  ;;  %v139_v10 = vpop.f32.mrf.mxu1 }
  0x9a   :  { %v135_v11 = vadd.f32 %v260_v8, %v134_v9  ;;  %v140_v12 = vadd.f32 %v260_v8, %v139_v10 }
  0x9c   :  { %v154_v13 = vmax.f32 %v135_v11, 0.0  ;;  %v156_v14 = vmax.f32 %v140_v12, 0.0 }
  0x9e   :  { %v162_v15 = vpack.c.bf16 %v154_v13, %v154_v13  ;;  %v164_v16 = vpack.c.bf16 %v156_v14, %v156_v14 }
  0xa0   :  { %171 = vst.msk [vmem:[#allocation7] sm:$0xf] %vm170_vm1, %v162_v15  ;;  %v144_v17 = vpop.f32.mrf.mxu2  ;;  %v149_v18 = vpop.f32.mrf.mxu3 }
  0xa1   :  { %173 = vst.msk [vmem:[#allocation7 + $0x8] sm:$0xf] %vm170_vm1, %v164_v16  ;;  %v145_v19 = vadd.f32 %v260_v8, %v144_v17  ;;  %v150_v20 = vadd.f32 %v260_v8, %v149_v18  ;;  %v136_v21 = vpop.f32.mrf.mxu0  ;;  %v141_v22 = vpop.f32.mrf.mxu1 }
  0xa2   :  { %v137_v23 = vadd.f32 %v260_v8, %v136_v21  ;;  %v142_v24 = vadd.f32 %v260_v8, %v141_v22 }
  0xa3   :  { %v158_v25 = vmax.f32 %v145_v19, 0.0  ;;  %v160_v26 = vmax.f32 %v150_v20, 0.0 }
  0xa4   :  { %v155_v27 = vmax.f32 %v137_v23, 0.0  ;;  %v157_v28 = vmax.f32 %v142_v24, 0.0 }
  0xa5   :  { %v166_v29 = vpack.c.bf16 %v158_v25, %v158_v25  ;;  %v168_v30 = vpack.c.bf16 %v160_v26, %v160_v26 }
  0xa6   :  { %v163_v31 = vpack.c.bf16 %v155_v27, %v155_v27  ;;  %v165_v32 = vpack.c.bf16 %v157_v28, %v157_v28 }
  0xa7   :  { %175 = vst.msk [vmem:[#allocation7 + $0x10] sm:$0xf] %vm170_vm1, %v166_v29 }
  0xa8   :  { %177 = vst.msk [vmem:[#allocation7 + $0x18] sm:$0xf] %vm170_vm1, %v168_v30  ;;  %v146_v33 = vpop.f32.mrf.mxu2  ;;  %v151_v34 = vpop.f32.mrf.mxu3 }
  0xa9   :  { %172 = vst.msk [vmem:[#allocation7 + $0x4] sm:$0xf] %vm170_vm1, %v163_v31  ;;  %v147_v35 = vadd.f32 %v260_v8, %v146_v33  ;;  %v152_v36 = vadd.f32 %v260_v8, %v151_v34 }
  0xaa   :  { %174 = vst.msk [vmem:[#allocation7 + $0xc] sm:$0xf] %vm170_vm1, %v165_v32 }
  0xab   :  { %v159_v37 = vmax.f32 %v147_v35, 0.0  ;;  %v161_v38 = vmax.f32 %v152_v36, 0.0 }
  0xad   :  { %v167_v39 = vpack.c.bf16 %v159_v37, %v159_v37  ;;  %v169_v40 = vpack.c.bf16 %v161_v38, %v161_v38 }
  0xaf   :  { %176 = vst.msk [vmem:[#allocation7 + $0x14] sm:$0xf] %vm170_vm1, %v167_v39 }
  0xb0   :  { %178 = vst.msk [vmem:[#allocation7 + $0x1c] sm:$0xf] %vm170_vm1, %v169_v40 }
  0xb1   :  { %191 = dma.vmem_to_hbm [thread:$0]  %s184_s24, 512, %s186_s27, [#allocation4], %s340_s20, %s340_s20, %s341_s21  }
  0xb2   :  { %337 = dma.done.wait [#allocation4], 512  }
  0xb3   :  { %338 = vsyncadd [#allocation4], 4294966784 }
  0xb4   :  { %196 = vsyncpa [#allocation3], 1 }
  0xb5   :  { %197 = vsyncpa [#allocation6], 1 }
  0xb6   :  { %198 = vsyncpa [#allocation4], 1 }

</bundles_post_ra>
